<compile_context>
chip_gen: v7x
topology: tpu7x:2x2x1
jax: 0.10.0
libtpu: 0.0.40
codegen_flags: <defaults>
</compile_context>

<pallas_src>
import functools

import jax
import jax.numpy as jnp
from jax import lax
from jax.experimental import pallas as pl
from jax.experimental.pallas import tpu as pltpu


def _round_up(x, m):
    return ((x + m - 1) // m) * m


# ---------------------------------------------------------------------------
# Kernels
# ---------------------------------------------------------------------------

def _glu_ffn_resident_kernel(x_ref, w1_ref, b1_ref, w2_ref, b2_ref,
                             w3_ref, b3_ref, o_ref, acc_ref, *, hk, nk):
    """Weights fully VMEM-resident; grid axis over row tiles only.

    Hidden dim walked in `nk` chunks of `hk` lanes so the SwiGLU epilogue of
    chunk k overlaps the MXU matmuls of chunk k+1 and the f32 intermediates
    stay [tm, hk] instead of [tm, 2H].
    """
    x = x_ref[...]
    acc_ref[...] = jnp.zeros_like(acc_ref)

    def chunk(k, carry):
        c = pl.multiple_of(k * hk, hk)
        h1 = jnp.dot(x, w1_ref[:, pl.ds(c, hk)],
                     preferred_element_type=jnp.float32) + b1_ref[:, pl.ds(c, hk)]
        h2 = jnp.dot(x, w2_ref[:, pl.ds(c, hk)],
                     preferred_element_type=jnp.float32) + b2_ref[:, pl.ds(c, hk)]
        # SwiGLU: silu(h1) * h2   (sigmoid -> EUP slot, muls -> VPU)
        g = (h1 * jax.nn.sigmoid(h1)) * h2
        # TODO(synk): on v7x the MRB could accumulate this dot in-place
        # instead of the explicit f32 VMEM add.
        acc_ref[...] += jnp.dot(g.astype(w3_ref.dtype),
                                w3_ref[pl.ds(c, hk), :],
                                preferred_element_type=jnp.float32)
        return carry

    lax.fori_loop(0, nk, chunk, 0, unroll=nk <= 8)
    o_ref[...] = (acc_ref[...] + b3_ref[...]).astype(o_ref.dtype)


def _glu_ffn_streamed_kernel(x_ref, w1_ref, b1_ref, w2_ref, b2_ref,
                             w3_ref, b3_ref, o_ref, acc_ref):
    """Streamed-weight path: grid = (row tiles, hidden chunks['arbitrary']).

    w1/w2 column chunks and matching w3 row chunks are pipelined from HBM;
    the output row tile accumulates in an f32 VMEM scratch.
    """
    k = pl.program_id(1)

    @pl.when(k == 0)
    def _():
        acc_ref[...] = jnp.zeros_like(acc_ref)

    x = x_ref[...]
    h1 = jnp.dot(x, w1_ref[...], preferred_element_type=jnp.float32) + b1_ref[...]
    h2 = jnp.dot(x, w2_ref[...], preferred_element_type=jnp.float32) + b2_ref[...]
    g = (h1 * jax.nn.sigmoid(h1)) * h2
    acc_ref[...] += jnp.dot(g.astype(w3_ref.dtype), w3_ref[...],
                            preferred_element_type=jnp.float32)

    @pl.when(k == pl.num_programs(1) - 1)
    def _():
        o_ref[...] = (acc_ref[...] + b3_ref[...]).astype(o_ref.dtype)


# ---------------------------------------------------------------------------
# One-time parameter preparation (NOT per forward)
# ---------------------------------------------------------------------------

def prepare_glu_ffn_params(w12_weight, w12_bias, w3_weight, w3_bias,
                           *, param_dtype=None):
    """PyTorch nn.Linear layout -> kernel layout.

      w12_weight [2H, in] -> w1_t [in, H], w2_t [in, H]
      w12_bias   [2H]     -> b1 [1, H] f32, b2 [1, H] f32
      w3_weight  [out, H] -> w3_t [H, out]
      w3_bias    [out]    -> b3 [1, out] f32

    For deployment pass param_dtype=jnp.bfloat16 so the MXU runs at bf16 peak;
    biases are pre-cast to f32 so the kernel epilogue has no per-step casts.
    """
    two_hidden = w12_weight.shape[0]
    hidden = two_hidden // 2
    out_features = w3_weight.shape[0]
    if param_dtype is not None:
        w12_weight = w12_weight.astype(param_dtype)
        w3_weight = w3_weight.astype(param_dtype)
    # w12.weight rows [0:H) are w1, [H:2H) are w2 (matches _packed_ordered_params).
    w1_t = jnp.transpose(w12_weight[:hidden])               # [in, H]
    w2_t = jnp.transpose(w12_weight[hidden:])               # [in, H]
    b1 = w12_bias[:hidden].astype(jnp.float32).reshape(1, hidden)
    b2 = w12_bias[hidden:].astype(jnp.float32).reshape(1, hidden)
    w3_t = jnp.transpose(w3_weight)                         # [H, out]
    b3 = w3_bias.astype(jnp.float32).reshape(1, out_features)
    return w1_t, b1, w2_t, b2, w3_t, b3


# ---------------------------------------------------------------------------
# Generation-aware defaults
# ---------------------------------------------------------------------------

def _tpu_defaults():
    """Returns (vmem_budget_bytes, default_tm, num_tensorcores)."""
    kind = ""
    try:
        kind = jax.devices()[0].device_kind.lower()
    except Exception:
        pass
    is_v5 = "v5" in kind
    is_v7 = "v7" in kind

    cap = None
    try:
        cap = int(pltpu.get_tpu_info().vmem_capacity_bytes)
    except Exception:
        cap = None
    if cap is None or cap <= 0:
        # v7x: 64 MiB per TC; v5e/v6e: 128 MiB; unknown: conservative 64 MiB.
        cap = (64 if (is_v7 or not kind) else 128) * 1024 * 1024

    headroom = min(16 * 1024 * 1024, cap // 4)
    budget = cap - headroom

    default_tm = 128 if is_v5 else 256      # v6e/v7x MXU is 256-wide
    num_tc = 2 if is_v7 else 1
    return budget, default_tm, num_tc


def _pick_hidden_chunk(hidden, requested=None):
    if requested is not None:
        assert hidden % requested == 0, "hidden_chunk must divide hidden"
        assert requested == hidden or requested % 128 == 0, \
            "hidden_chunk must be a multiple of 128 (lane tile)"
        return requested
    if hidden % 128 != 0:
        # TODO(synk): non-128-multiple hidden: skip chunking (slices would
        # cross lane-tile boundaries and materialize copies).
        return hidden
    for c in (1024, 512, 256):
        if hidden % c == 0 and hidden // c >= 2:
            return c
    return hidden


# ---------------------------------------------------------------------------
# Forward
# ---------------------------------------------------------------------------

def glu_ffn(x, w1_t, b1, w2_t, b2, w3_t, b3, *, tm=None, hidden_chunk=None,
            force_streamed=False):
    """Forward pass of GLUFFNBase (SwiGLU op).

    x: [..., in_features]; params from prepare_glu_ffn_params.
    Returns [..., out_features].
    """
    in_features, hidden = w1_t.shape
    out_features = w3_t.shape[1]
    assert x.shape[-1] == in_features
    assert w2_t.shape == (in_features, hidden)
    assert w3_t.shape[0] == hidden

    lead_shape = x.shape[:-1]
    M = 1
    for d in lead_shape:
        M *= d
    x2d = x.reshape(M, in_features)
    out_dtype = x.dtype

    budget, default_tm, num_tc = _tpu_defaults()
    x_isz = jnp.dtype(x.dtype).itemsize
    w_isz = jnp.dtype(w1_t.dtype).itemsize
    o_isz = jnp.dtype(out_dtype).itemsize

    # Sub-32-bit dtypes pack rows along sublanes: 16-row align for bf16,
    # 32-row for int8/fp8, 8-row for f32.
    row_align = max(8, 32 // x_isz)

    hk = _pick_hidden_chunk(hidden, hidden_chunk)
    nk = hidden // hk

    tm_req = default_tm if tm is None else tm
    tm_cap = min(tm_req, _round_up(max(M, 1), row_align))
    # v7x: 2 TensorCores sharded over the 'parallel' row axis -- make sure
    # small calls still produce >= 2 row tiles so the second core has work.
    while (num_tc > 1 and M > row_align and tm_cap > row_align
           and pl.cdiv(M, tm_cap) < num_tc):
        tm_cap = max(row_align, _round_up((tm_cap + 1) // 2, row_align))

    # VMEM accounting: double-buffered x/out tiles, f32 accumulator, and the
    # per-chunk f32 intermediates (h1, h2, gated).
    def tile_bytes(tm_):
        return (2 * tm_ * in_features * x_isz
                + 2 * tm_ * out_features * o_isz
                + tm_ * out_features * 4
                + 3 * tm_ * hk * 4)

    resident_w_bytes = ((2 * in_features * hidden + hidden * out_features) * w_isz
                        + (2 * hidden + out_features) * 4)        # single-buffered
    streamed_w_bytes = (2 * (2 * in_features * hk + hk * out_features) * w_isz
                        + (2 * hk + out_features) * 4)            # double-buffered chunks

    def shrink_to_fit(tm0, weight_bytes):
        t = tm0
        while t > row_align and weight_bytes + tile_bytes(t) > budget:
            t = max(row_align, _round_up((t + 1) // 2, row_align))
        return t, weight_bytes + tile_bytes(t) <= budget

    tm_res, resident_fits = shrink_to_fit(tm_cap, resident_w_bytes)
    use_streamed = force_streamed or not resident_fits

    if not use_streamed:
        tm_eff = tm_res
        grid = (pl.cdiv(M, tm_eff),)
        kernel = functools.partial(_glu_ffn_resident_kernel, hk=hk, nk=nk)
        const = dict(pipeline_mode=pl.Buffered(1))   # weights resident: 1 buffer
        out2d = pl.pallas_call(
            kernel,
            out_shape=jax.ShapeDtypeStruct((M, out_features), out_dtype),
            grid_spec=pltpu.PrefetchScalarGridSpec(
                num_scalar_prefetch=0,
                grid=grid,
                in_specs=[
                    pl.BlockSpec((tm_eff, in_features), lambda i: (i, 0)),
                    pl.BlockSpec((in_features, hidden), lambda i: (0, 0), **const),
                    pl.BlockSpec((1, hidden), lambda i: (0, 0), **const),
                    pl.BlockSpec((in_features, hidden), lambda i: (0, 0), **const),
                    pl.BlockSpec((1, hidden), lambda i: (0, 0), **const),
                    pl.BlockSpec((hidden, out_features), lambda i: (0, 0), **const),
                    pl.BlockSpec((1, out_features), lambda i: (0, 0), **const),
                ],
                out_specs=pl.BlockSpec((tm_eff, out_features), lambda i: (i, 0)),
                scratch_shapes=[pltpu.VMEM((tm_eff, out_features), jnp.float32)],
            ),
            compiler_params=pltpu.CompilerParams(
                dimension_semantics=("parallel",),
                vmem_limit_bytes=int(budget)),
        )(x2d, w1_t, b1, w2_t, b2, w3_t, b3)
    else:
        # Streamed-weight path: weights too large to be VMEM-resident (e.g.
        # realistic FFNs on v7x's 64 MiB per-TC VMEM). Hidden axis last,
        # 'arbitrary', with an f32 accumulator over output row tiles.
        tm_eff, streamed_fits = shrink_to_fit(tm_cap, streamed_w_bytes)
        # TODO(synk): if even one streamed hidden chunk does not fit, also tile
        #             out_features; not needed for realistic FFN shapes.
        grid = (pl.cdiv(M, tm_eff), nk)
        out2d = pl.pallas_call(
            _glu_ffn_streamed_kernel,
            out_shape=jax.ShapeDtypeStruct((M, out_features), out_dtype),
            grid_spec=pltpu.PrefetchScalarGridSpec(
                num_scalar_prefetch=0,
                grid=grid,
                in_specs=[
                    pl.BlockSpec((tm_eff, in_features), lambda i, k: (i, 0)),
                    pl.BlockSpec((in_features, hk), lambda i, k: (0, k)),
                    pl.BlockSpec((1, hk), lambda i, k: (0, k)),
                    pl.BlockSpec((in_features, hk), lambda i, k: (0, k)),
                    pl.BlockSpec((1, hk), lambda i, k: (0, k)),
                    pl.BlockSpec((hk, out_features), lambda i, k: (k, 0)),
                    pl.BlockSpec((1, out_features), lambda i, k: (0, 0),
                                 pipeline_mode=pl.Buffered(1)),
                ],
                out_specs=pl.BlockSpec((tm_eff, out_features), lambda i, k: (i, 0)),
                scratch_shapes=[pltpu.VMEM((tm_eff, out_features), jnp.float32)],
            ),
            compiler_params=pltpu.CompilerParams(
                dimension_semantics=("parallel", "arbitrary"),
                vmem_limit_bytes=int(budget)),
        )(x2d, w1_t, b1, w2_t, b2, w3_t, b3)

    return out2d.reshape(*lead_shape, out_features)


# ---------------------------------------------------------------------------
# Reference + test
# ---------------------------------------------------------------------------

def _reference(x, w12_weight, w12_bias, w3_weight, w3_bias):
    hidden = w12_weight.shape[0] // 2
    h1 = x @ w12_weight[:hidden].T + w12_bias[:hidden]
    h2 = x @ w12_weight[hidden:].T + w12_bias[hidden:]
    return (jax.nn.silu(h1) * h2) @ w3_weight.T + w3_bias


if __name__ == "__main__":
    # Small but lane-dense shapes (hidden/out multiples of 128 so slices land
    # on lane-tile boundaries and stores are unmasked).
    batch, seq = 2, 8
    in_features, hidden_features, out_features = 128, 256, 128

    key = jax.random.PRNGKey(0)
    kx, kw12, kb12, kw3, kb3 = jax.random.split(key, 5)

    x = jax.random.normal(kx, (batch, seq, in_features), dtype=jnp.float32)

    # Deterministic init mimicking nn.Linear (uniform +/- 1/sqrt(fan_in)).
    bound12 = 1.0 / (in_features ** 0.5)
    w12_weight = jax.random.uniform(kw12, (2 * hidden_features, in_features),
                                    minval=-bound12, maxval=bound12, dtype=jnp.float32)
    w12_bias = jax.random.uniform(kb12, (2 * hidden_features,),
                                  minval=-bound12, maxval=bound12, dtype=jnp.float32)
    bound3 = 1.0 / (hidden_features ** 0.5)
    w3_weight = jax.random.uniform(kw3, (out_features, hidden_features),
                                   minval=-bound3, maxval=bound3, dtype=jnp.float32)
    w3_bias = jax.random.uniform(kb3, (out_features,),
                                 minval=-bound3, maxval=bound3, dtype=jnp.float32)

    # One-time parameter prep (transpose/split/bias-cast outside the hot path).
    params = prepare_glu_ffn_params(w12_weight, w12_bias, w3_weight, w3_bias)
    ref = _reference(x, w12_weight, w12_bias, w3_weight, w3_bias)

    # Resident-weight fast path (intra-kernel hidden chunking, 2 chunks here).
    out = jax.block_until_ready(glu_ffn(x, *params, hidden_chunk=128))
    assert out.shape == (batch, seq, out_features), out.shape
    assert jnp.allclose(out, ref, atol=1e-4, rtol=1e-4), \
        float(jnp.max(jnp.abs(out - ref)))

    # Streamed-weight fallback path (v7x large-weight case), forced here to
    # verify the hidden-axis accumulator is correct.
    out_s = jax.block_until_ready(glu_ffn(x, *params, hidden_chunk=128,
                                          force_streamed=True))
    assert jnp.allclose(out_s, ref, atol=1e-4, rtol=1e-4), \
        float(jnp.max(jnp.abs(out_s - ref)))

    print("KERNEL_OK")
</pallas_src>

<mosaic_0001>
module attributes {stable_mosaic.version = 11 : i64} {
  func.func @_glu_ffn_resident_kernel(%arg0: i32, %arg1: memref<16x128xf32, #tpu.memory_space<vmem>>, %arg2: memref<128x256xf32, #tpu.memory_space<vmem>>, %arg3: memref<1x256xf32, #tpu.memory_space<vmem>>, %arg4: memref<128x256xf32, #tpu.memory_space<vmem>>, %arg5: memref<1x256xf32, #tpu.memory_space<vmem>>, %arg6: memref<256x128xf32, #tpu.memory_space<vmem>>, %arg7: memref<1x128xf32, #tpu.memory_space<vmem>>, %arg8: memref<16x128xf32, #tpu.memory_space<vmem>>, %arg9: memref<16x128xf32, #tpu.memory_space<vmem>>) attributes {dimension_semantics = [#tpu.dimension_semantics<parallel>], iteration_bounds = array<i64: 1>, scalar_prefetch = 0 : i64, scratch_operands = 1 : i64, tpu.core_type = #tpu.core_type<tc>, window_params = [{transform_indices = @transform_0, window_bounds = array<i64: 16, 128>}, {pipeline_mode = #tpu.pipeline_mode<synchronous>, transform_indices = @transform_1, window_bounds = array<i64: 128, 256>}, {pipeline_mode = #tpu.pipeline_mode<synchronous>, transform_indices = @transform_2, window_bounds = array<i64: 1, 256>}, {pipeline_mode = #tpu.pipeline_mode<synchronous>, transform_indices = @transform_3, window_bounds = array<i64: 128, 256>}, {pipeline_mode = #tpu.pipeline_mode<synchronous>, transform_indices = @transform_4, window_bounds = array<i64: 1, 256>}, {pipeline_mode = #tpu.pipeline_mode<synchronous>, transform_indices = @transform_5, window_bounds = array<i64: 256, 128>}, {pipeline_mode = #tpu.pipeline_mode<synchronous>, transform_indices = @transform_6, window_bounds = array<i64: 1, 128>}, {transform_indices = @transform_7, window_bounds = array<i64: 16, 128>}]} {
    %c0 = arith.constant 0 : index
    %c0_0 = arith.constant 0 : index
    %0 = vector.load %arg1[%c0, %c0_0] : memref<16x128xf32, #tpu.memory_space<vmem>>, vector<16x128xf32>
    %cst = arith.constant 0.000000e+00 : f32
    %1 = vector.broadcast %cst : f32 to vector<16x128xf32>
    %c0_1 = arith.constant 0 : index
    %c0_2 = arith.constant 0 : index
    %2 = vector.load %arg9[%c0_1, %c0_2] : memref<16x128xf32, #tpu.memory_space<vmem>>, vector<16x128xf32>
    tpu.vector_store %arg9[%c0_1, %c0_2], %1 {strides = array<i32>} : memref<16x128xf32, #tpu.memory_space<vmem>>, vector<16x128xf32>,
    %c0_i32 = arith.constant 0 : i32
    %c128_i32 = arith.constant 128 : i32
    %3 = arith.muli %c0_i32, %c128_i32 : i32
    %4 = tpu.assume_multiple %3, 128 : i32
    %c0_3 = arith.constant 0 : index
    %5 = arith.index_cast %4 : i32 to index
    %6 = vector.load %arg2[%c0_3, %5] : memref<128x256xf32, #tpu.memory_space<vmem>>, vector<128x128xf32>
    %cst_4 = arith.constant dense<0.000000e+00> : vector<16x128xf32>
    %7 = tpu.matmul %0, %6, %cst_4 {dimension_numbers = #tpu.dot_dimension_numbers<[1], [0], [0], [1], [0, 0, 1, 1], [], []>} : vector<16x128xf32>, vector<128x128xf32>, vector<16x128xf32> -> vector<16x128xf32>
    %c0_5 = arith.constant 0 : index
    %8 = arith.index_cast %4 : i32 to index
    %9 = vector.load %arg3[%c0_5, %8] : memref<1x256xf32, #tpu.memory_space<vmem>>, vector<1x128xf32>
    %10 = vector.broadcast %9 : vector<1x128xf32> to vector<16x128xf32>
    %11 = arith.addf %7, %10 : vector<16x128xf32>
    %c0_6 = arith.constant 0 : index
    %12 = arith.index_cast %4 : i32 to index
    %13 = vector.load %arg4[%c0_6, %12] : memref<128x256xf32, #tpu.memory_space<vmem>>, vector<128x128xf32>
    %cst_7 = arith.constant dense<0.000000e+00> : vector<16x128xf32>
    %14 = tpu.matmul %0, %13, %cst_7 {dimension_numbers = #tpu.dot_dimension_numbers<[1], [0], [0], [1], [0, 0, 1, 1], [], []>} : vector<16x128xf32>, vector<128x128xf32>, vector<16x128xf32> -> vector<16x128xf32>
    %c0_8 = arith.constant 0 : index
    %15 = arith.index_cast %4 : i32 to index
    %16 = vector.load %arg5[%c0_8, %15] : memref<1x256xf32, #tpu.memory_space<vmem>>, vector<1x128xf32>
    %17 = vector.broadcast %16 : vector<1x128xf32> to vector<16x128xf32>
    %18 = arith.addf %14, %17 : vector<16x128xf32>
    %19 = arith.negf %11 : vector<16x128xf32>
    %20 = math.exp %19 : vector<16x128xf32>
    %cst_9 = arith.constant 1.000000e+00 : f32
    %21 = vector.broadcast %cst_9 : f32 to vector<16x128xf32>
    %22 = arith.addf %21, %20 : vector<16x128xf32>
    %23 = arith.divf %21, %22 : vector<16x128xf32>
    %24 = arith.mulf %11, %23 : vector<16x128xf32>
    %25 = arith.mulf %24, %18 : vector<16x128xf32>
    %c0_10 = arith.constant 0 : index
    %c0_11 = arith.constant 0 : index
    %26 = vector.load %arg9[%c0_10, %c0_11] : memref<16x128xf32, #tpu.memory_space<vmem>>, vector<16x128xf32>
    %27 = arith.index_cast %4 : i32 to index
    %c0_12 = arith.constant 0 : index
    %28 = vector.load %arg6[%27, %c0_12] : memref<256x128xf32, #tpu.memory_space<vmem>>, vector<128x128xf32>
    %cst_13 = arith.constant dense<0.000000e+00> : vector<16x128xf32>
    %29 = tpu.matmul %25, %28, %cst_13 {dimension_numbers = #tpu.dot_dimension_numbers<[1], [0], [0], [1], [0, 0, 1, 1], [], []>} : vector<16x128xf32>, vector<128x128xf32>, vector<16x128xf32> -> vector<16x128xf32>
    %30 = arith.addf %26, %29 : vector<16x128xf32>
    %c0_14 = arith.constant 0 : index
    %c0_15 = arith.constant 0 : index
    %31 = vector.load %arg9[%c0_14, %c0_15] : memref<16x128xf32, #tpu.memory_space<vmem>>, vector<16x128xf32>
    tpu.vector_store %arg9[%c0_14, %c0_15], %30 {strides = array<i32>} : memref<16x128xf32, #tpu.memory_space<vmem>>, vector<16x128xf32>,
    %c1_i32 = arith.constant 1 : i32
    %c128_i32_16 = arith.constant 128 : i32
    %32 = arith.muli %c1_i32, %c128_i32_16 : i32
    %33 = tpu.assume_multiple %32, 128 : i32
    %c0_17 = arith.constant 0 : index
    %34 = arith.index_cast %33 : i32 to index
    %35 = vector.load %arg2[%c0_17, %34] : memref<128x256xf32, #tpu.memory_space<vmem>>, vector<128x128xf32>
    %cst_18 = arith.constant dense<0.000000e+00> : vector<16x128xf32>
    %36 = tpu.matmul %0, %35, %cst_18 {dimension_numbers = #tpu.dot_dimension_numbers<[1], [0], [0], [1], [0, 0, 1, 1], [], []>} : vector<16x128xf32>, vector<128x128xf32>, vector<16x128xf32> -> vector<16x128xf32>
    %c0_19 = arith.constant 0 : index
    %37 = arith.index_cast %33 : i32 to index
    %38 = vector.load %arg3[%c0_19, %37] : memref<1x256xf32, #tpu.memory_space<vmem>>, vector<1x128xf32>
    %39 = vector.broadcast %38 : vector<1x128xf32> to vector<16x128xf32>
    %40 = arith.addf %36, %39 : vector<16x128xf32>
    %c0_20 = arith.constant 0 : index
    %41 = arith.index_cast %33 : i32 to index
    %42 = vector.load %arg4[%c0_20, %41] : memref<128x256xf32, #tpu.memory_space<vmem>>, vector<128x128xf32>
    %cst_21 = arith.constant dense<0.000000e+00> : vector<16x128xf32>
    %43 = tpu.matmul %0, %42, %cst_21 {dimension_numbers = #tpu.dot_dimension_numbers<[1], [0], [0], [1], [0, 0, 1, 1], [], []>} : vector<16x128xf32>, vector<128x128xf32>, vector<16x128xf32> -> vector<16x128xf32>
    %c0_22 = arith.constant 0 : index
    %44 = arith.index_cast %33 : i32 to index
    %45 = vector.load %arg5[%c0_22, %44] : memref<1x256xf32, #tpu.memory_space<vmem>>, vector<1x128xf32>
    %46 = vector.broadcast %45 : vector<1x128xf32> to vector<16x128xf32>
    %47 = arith.addf %43, %46 : vector<16x128xf32>
    %48 = arith.negf %40 : vector<16x128xf32>
    %49 = math.exp %48 : vector<16x128xf32>
    %cst_23 = arith.constant 1.000000e+00 : f32
    %50 = vector.broadcast %cst_23 : f32 to vector<16x128xf32>
    %51 = arith.addf %50, %49 : vector<16x128xf32>
    %52 = arith.divf %50, %51 : vector<16x128xf32>
    %53 = arith.mulf %40, %52 : vector<16x128xf32>
    %54 = arith.mulf %53, %47 : vector<16x128xf32>
    %c0_24 = arith.constant 0 : index
    %c0_25 = arith.constant 0 : index
    %55 = vector.load %arg9[%c0_24, %c0_25] : memref<16x128xf32, #tpu.memory_space<vmem>>, vector<16x128xf32>
    %56 = arith.index_cast %33 : i32 to index
    %c0_26 = arith.constant 0 : index
    %57 = vector.load %arg6[%56, %c0_26] : memref<256x128xf32, #tpu.memory_space<vmem>>, vector<128x128xf32>
    %cst_27 = arith.constant dense<0.000000e+00> : vector<16x128xf32>
    %58 = tpu.matmul %54, %57, %cst_27 {dimension_numbers = #tpu.dot_dimension_numbers<[1], [0], [0], [1], [0, 0, 1, 1], [], []>} : vector<16x128xf32>, vector<128x128xf32>, vector<16x128xf32> -> vector<16x128xf32>
    %59 = arith.addf %55, %58 : vector<16x128xf32>
    %c0_28 = arith.constant 0 : index
    %c0_29 = arith.constant 0 : index
    %60 = vector.load %arg9[%c0_28, %c0_29] : memref<16x128xf32, #tpu.memory_space<vmem>>, vector<16x128xf32>
    tpu.vector_store %arg9[%c0_28, %c0_29], %59 {strides = array<i32>} : memref<16x128xf32, #tpu.memory_space<vmem>>, vector<16x128xf32>,
    %c2_i32 = arith.constant 2 : i32
    %c0_30 = arith.constant 0 : index
    %c0_31 = arith.constant 0 : index
    %61 = vector.load %arg9[%c0_30, %c0_31] : memref<16x128xf32, #tpu.memory_space<vmem>>, vector<16x128xf32>
    %c0_32 = arith.constant 0 : index
    %c0_33 = arith.constant 0 : index
    %62 = vector.load %arg7[%c0_32, %c0_33] : memref<1x128xf32, #tpu.memory_space<vmem>>, vector<1x128xf32>
    %63 = vector.broadcast %62 : vector<1x128xf32> to vector<16x128xf32>
    %64 = arith.addf %61, %63 : vector<16x128xf32>
    %c0_34 = arith.constant 0 : index
    %c0_35 = arith.constant 0 : index
    %65 = vector.load %arg8[%c0_34, %c0_35] : memref<16x128xf32, #tpu.memory_space<vmem>>, vector<16x128xf32>
    tpu.vector_store %arg8[%c0_34, %c0_35], %64 {strides = array<i32>} : memref<16x128xf32, #tpu.memory_space<vmem>>, vector<16x128xf32>,
    return
  }
  func.func @transform_0(%arg0: i32) -> (i32, i32) {
    %c0_i32 = arith.constant 0 : i32
    %c0_i32_0 = arith.constant 0 : i32
    return %arg0, %c0_i32 : i32, i32
  }
  func.func @transform_1(%arg0: i32) -> (i32, i32) {
    %c0_i32 = arith.constant 0 : i32
    %c0_i32_0 = arith.constant 0 : i32
    %c0_i32_1 = arith.constant 0 : i32
    return %c0_i32, %c0_i32_0 : i32, i32
  }
  func.func @transform_2(%arg0: i32) -> (i32, i32) {
    %c0_i32 = arith.constant 0 : i32
    %c0_i32_0 = arith.constant 0 : i32
    %c0_i32_1 = arith.constant 0 : i32
    return %c0_i32, %c0_i32_0 : i32, i32
  }
  func.func @transform_3(%arg0: i32) -> (i32, i32) {
    %c0_i32 = arith.constant 0 : i32
    %c0_i32_0 = arith.constant 0 : i32
    %c0_i32_1 = arith.constant 0 : i32
    return %c0_i32, %c0_i32_0 : i32, i32
  }
  func.func @transform_4(%arg0: i32) -> (i32, i32) {
    %c0_i32 = arith.constant 0 : i32
    %c0_i32_0 = arith.constant 0 : i32
    %c0_i32_1 = arith.constant 0 : i32
    return %c0_i32, %c0_i32_0 : i32, i32
  }
  func.func @transform_5(%arg0: i32) -> (i32, i32) {
    %c0_i32 = arith.constant 0 : i32
    %c0_i32_0 = arith.constant 0 : i32
    %c0_i32_1 = arith.constant 0 : i32
    return %c0_i32, %c0_i32_0 : i32, i32
  }
  func.func @transform_6(%arg0: i32) -> (i32, i32) {
    %c0_i32 = arith.constant 0 : i32
    %c0_i32_0 = arith.constant 0 : i32
    %c0_i32_1 = arith.constant 0 : i32
    return %c0_i32, %c0_i32_0 : i32, i32
  }
  func.func @transform_7(%arg0: i32) -> (i32, i32) {
    %c0_i32 = arith.constant 0 : i32
    %c0_i32_0 = arith.constant 0 : i32
    return %arg0, %c0_i32 : i32, i32
  }
}

</mosaic_0001>

<bundles_post_ra>
// kernel: tpu_custom_call.1
= control target key start
LH: loop header
LB: loop body
LE: loop exit
PB: predicated region body
PF: predicated region fallthrough
CT: control target
= control target key end

     0   :  { %12 = vsyncpa [#allocation4], 0  ;;  %s1687_s0 = inlined_call_operand.hbm [shape: f32[16,128], index: 0, kind: input, shape index: {}]   ;;  %s1688_s1 = inlined_call_operand.hbm [shape: f32[128,256], index: 1, kind: input, shape index: {}]   ;;  %s1689_s2 = inlined_call_operand.hbm [shape: f32[1,256], index: 2, kind: input, shape index: {}]   ;;  %s1690_s3 = inlined_call_operand.hbm [shape: f32[128,256], index: 3, kind: input, shape index: {}]   ;;  %s1691_s4 = inlined_call_operand.hbm [shape: f32[1,256], index: 4, kind: input, shape index: {}]   ;;  %s1692_s5 = inlined_call_operand.hbm [shape: f32[256,128], index: 5, kind: input, shape index: {}]   ;;  %s1693_s6 = inlined_call_operand.hbm [shape: f32[1,128], index: 6, kind: input, shape index: {}]   ;;  %s1694_s7 = inlined_call_operand.hbm [shape: f32[16,128], index: 7, kind: output, shape index: {}]  }
   0x1   :  { %13 = vsyncpa [#allocation7], 0 }
   0x2   :  { %14 = vsyncpa [#allocation10], 0 }
   0x3   :  { %15 = vsyncpa [#allocation13], 0 }
   0x4   :  { %16 = vsyncpa [#allocation5], 0  ;;  %s1511_s24 = smov [#allocation6]   ;;  %s1325_s28 = scalar_lea.hbm %s1688_s1, 4096 }
   0x5   :  { %s34_s25 = sshll.u32 %s1511_s24, 4  ;;  %p1326_p0 = scmp.ne.s32.totalorder %s1688_s1, %s1325_s28  ;;  %s35_s25 = int_to_ptr.vmem [resolvable:$true] %s34_s25 }
   0x6   :  { %p1329_p1 = scmp.lt.u32.totalorder %s1325_s28, %s1688_s1 }
   0x8   :  { %p1331_p2 = pnand %p1329_p1, %p1326_p0 }
   0xa   :  { %1334 = shalt.err (!%p1331_p2)
}
   0xb   :  { %s1335_s10 = scalar_lea.vmem %s35_s25, 4096  ;;  %p1340_p4 = scmp.lt.s32.totalorder %s35_s25, %s35_s25 }
   0xc   :  { %p1336_p3 = scmp.ne.s32.totalorder %s35_s25, %s1335_s10  ;;  %p1341_p5 = scmp.lt.s32.totalorder %s1335_s10, %s1335_s10 }
   0xe   :  { %p1342_p6 = por %p1341_p5, %p1340_p4 }
  0x10   :  { %p1343_p7 = pnand %p1342_p6, %p1336_p3 }
  0x12   :  { %1346 = shalt.err (!%p1343_p7)
}
  0x13   :  { %s1512_s11 = smov 256   ;;  %s1513_s12 = smov 16  }
  0x14   :  { %40 = dma.hbm_to_vmem [thread:$0]  %s1688_s1, 4096, %s35_s25, [#allocation7], %s1512_s11, %s1512_s11, %s1513_s12  }
  0x15   :  { %s1514_s15 = smov [#allocation9]   ;;  %s1347_s19 = scalar_lea.hbm %s1690_s3, 4096 }
  0x16   :  { %s56_s16 = sshll.u32 %s1514_s15, 4  ;;  %p1348_p8 = scmp.ne.s32.totalorder %s1690_s3, %s1347_s19  ;;  %s57_s16 = int_to_ptr.vmem [resolvable:$true] %s56_s16 }
  0x17   :  { %p1351_p9 = scmp.lt.u32.totalorder %s1347_s19, %s1690_s3 }
  0x19   :  { %p1353_p10 = pnand %p1351_p9, %p1348_p8 }
  0x1b   :  { %1356 = shalt.err (!%p1353_p10)
}
  0x1c   :  { %s1357_s24 = scalar_lea.vmem %s57_s16, 4096  ;;  %p1362_p12 = scmp.lt.s32.totalorder %s57_s16, %s57_s16 }
  0x1d   :  { %p1358_p11 = scmp.ne.s32.totalorder %s57_s16, %s1357_s24  ;;  %p1363_p13 = scmp.lt.s32.totalorder %s1357_s24, %s1357_s24 }
  0x1f   :  { %p1364_p0 = por %p1363_p13, %p1362_p12 }
  0x21   :  { %p1365_p1 = pnand %p1364_p0, %p1358_p11 }
  0x23   :  { %1368 = shalt.err (!%p1365_p1)
}
  0x24   :  { %62 = dma.hbm_to_vmem [thread:$0]  %s1690_s3, 4096, %s57_s16, [#allocation10], %s1512_s11, %s1512_s11, %s1513_s12  }
  0x25   :  { %s1515_s26 = smov [#allocation12]   ;;  %s1516_s28 = smov [#allocation3]  }
  0x26   :  { %s78_s27 = sshll.u32 %s1515_s26, 4  ;;  %s22_s29 = sshll.u32 %s1516_s28, 4  ;;  %s79_s27 = int_to_ptr.vmem [resolvable:$true] %s78_s27  ;;  %s1587_s29 = int_to_ptr.vmem [resolvable:$true] %s22_s29 }
  0x27   :  { %s1369_s9 = scalar_lea.hbm %s1692_s5, 4096 }
  0x28   :  { %p1370_p2 = scmp.ne.s32.totalorder %s1692_s5, %s1369_s9  ;;  %p1373_p3 = scmp.lt.u32.totalorder %s1369_s9, %s1692_s5 }
  0x2a   :  { %p1375_p4 = pnand %p1373_p3, %p1370_p2 }
  0x2c   :  { %1378 = shalt.err (!%p1375_p4)
}
  0x2d   :  { %s1379_s3 = scalar_lea.vmem %s79_s27, 4096  ;;  %p1384_p6 = scmp.lt.s32.totalorder %s79_s27, %s79_s27 }
  0x2e   :  { %p1380_p5 = scmp.ne.s32.totalorder %s79_s27, %s1379_s3  ;;  %p1385_p7 = scmp.lt.s32.totalorder %s1379_s3, %s1379_s3 }
  0x30   :  { %p1386_p8 = por %p1385_p7, %p1384_p6 }
  0x32   :  { %p1387_p9 = pnand %p1386_p8, %p1380_p5 }
  0x34   :  { %1390 = shalt.err (!%p1387_p9)
}
  0x35   :  { %s1517_s11 = smov 128   ;;  %s1518_s12 = smov 8  }
  0x36   :  { %84 = dma.hbm_to_vmem [thread:$0]  %s1692_s5, 4096, %s79_s27, [#allocation13], %s1517_s11, %s1517_s11, %s1518_s12  }
  0x37   :  { %s1391_s20 = scalar_lea.hbm %s1687_s0, 256 }
  0x38   :  { %p1392_p10 = scmp.ne.s32.totalorder %s1687_s0, %s1391_s20  ;;  %p1395_p11 = scmp.lt.u32.totalorder %s1391_s20, %s1687_s0 }
  0x3a   :  { %p1397_p12 = pnand %p1395_p11, %p1392_p10 }
  0x3c   :  { %1400 = shalt.err (!%p1397_p12)
}
  0x3d   :  { %s1401_s1 = scalar_lea.vmem %s1587_s29, 256  ;;  %p1406_p0 = scmp.lt.s32.totalorder %s1587_s29, %s1587_s29 }
  0x3e   :  { %p1402_p13 = scmp.ne.s32.totalorder %s1587_s29, %s1401_s1  ;;  %p1407_p1 = scmp.lt.s32.totalorder %s1401_s1, %s1401_s1 }
  0x40   :  { %p1408_p2 = por %p1407_p1, %p1406_p0 }
  0x42   :  { %p1409_p3 = pnand %p1408_p2, %p1402_p13 }
  0x44   :  { %1412 = shalt.err (!%p1409_p3)
}
  0x45   :  { %28 = dma.hbm_to_vmem [thread:$0]  %s1687_s0, 256, %s1587_s29, [#allocation4], %s1517_s11, %s1517_s11, %s1518_s12  }
  0x46   :  { %s1519_s26 = smov [#allocation8]   ;;  %s1520_s28 = smov [#allocation11]  }
  0x47   :  { %s47_s27 = sshll.u32 %s1519_s26, 4  ;;  %s69_s30 = sshll.u32 %s1520_s28, 4  ;;  %s48_s27 = int_to_ptr.vmem [resolvable:$true] %s47_s27  ;;  %s70_s30 = int_to_ptr.vmem [resolvable:$true] %s69_s30 }
  0x48   :  { %s1413_s10 = scalar_lea.hbm %s1689_s2, 32 }
  0x49   :  { %p1414_p4 = scmp.ne.s32.totalorder %s1689_s2, %s1413_s10  ;;  %p1417_p5 = scmp.lt.u32.totalorder %s1413_s10, %s1689_s2 }
  0x4b   :  { %p1419_p6 = pnand %p1417_p5, %p1414_p4 }
  0x4d   :  { %1422 = shalt.err (!%p1419_p6)
}
  0x4e   :  { %s1423_s0 = scalar_lea.vmem %s48_s27, 32  ;;  %p1428_p8 = scmp.lt.s32.totalorder %s48_s27, %s48_s27 }
  0x4f   :  { %p1424_p7 = scmp.ne.s32.totalorder %s48_s27, %s1423_s0  ;;  %p1429_p9 = scmp.lt.s32.totalorder %s1423_s0, %s1423_s0 }
  0x51   :  { %p1430_p10 = por %p1429_p9, %p1428_p8 }
  0x53   :  { %p1431_p11 = pnand %p1430_p10, %p1424_p7 }
  0x55   :  { %1434 = shalt.err (!%p1431_p11)
}
  0x56   :  { %50 = dma.hbm_to_vmem [thread:$0]  %s1689_s2, 32, %s48_s27, [#allocation7]  }
  0x57   :  { %s1435_s19 = scalar_lea.hbm %s1691_s4, 32 }
  0x58   :  { %p1436_p12 = scmp.ne.s32.totalorder %s1691_s4, %s1435_s19  ;;  %p1439_p13 = scmp.lt.u32.totalorder %s1435_s19, %s1691_s4 }
  0x5a   :  { %p1441_p0 = pnand %p1439_p13, %p1436_p12 }
  0x5c   :  { %1444 = shalt.err (!%p1441_p0)
}
  0x5d   :  { %s1445_s24 = scalar_lea.vmem %s70_s30, 32  ;;  %p1450_p2 = scmp.lt.s32.totalorder %s70_s30, %s70_s30 }
  0x5e   :  { %p1446_p1 = scmp.ne.s32.totalorder %s70_s30, %s1445_s24  ;;  %p1451_p3 = scmp.lt.s32.totalorder %s1445_s24, %s1445_s24 }
  0x60   :  { %p1452_p4 = por %p1451_p3, %p1450_p2 }
  0x62   :  { %p1453_p5 = pnand %p1452_p4, %p1446_p1 }
  0x64   :  { %1456 = shalt.err (!%p1453_p5)
}
  0x65   :  { %72 = dma.hbm_to_vmem [thread:$0]  %s1691_s4, 32, %s70_s30, [#allocation10]  }
  0x66   :  { %s1521_s5 = smov [#allocation14]   ;;  %s1457_s28 = scalar_lea.hbm %s1693_s6, 16 }
  0x67   :  { %s91_s25 = sshll.u32 %s1521_s5, 4  ;;  %p1458_p6 = scmp.ne.s32.totalorder %s1693_s6, %s1457_s28  ;;  %s92_s25 = int_to_ptr.vmem [resolvable:$true] %s91_s25 }
  0x68   :  { %p1461_p7 = scmp.lt.u32.totalorder %s1457_s28, %s1693_s6 }
  0x6a   :  { %p1463_p8 = pnand %p1461_p7, %p1458_p6 }
  0x6c   :  { %1466 = shalt.err (!%p1463_p8)
}
  0x6d   :  { %s1467_s14 = scalar_lea.vmem %s92_s25, 16  ;;  %s1471_s4 = scalar_lea.vmem %s92_s25, 32 }
  0x6e   :  { %p1468_p9 = scmp.ne.s32.totalorder %s92_s25, %s1467_s14  ;;  %p1472_p10 = scmp.lt.s32.totalorder %s92_s25, %s92_s25 }
  0x6f   :  { %p1473_p11 = scmp.lt.s32.totalorder %s1471_s4, %s1467_s14 }
  0x71   :  { %p1474_p12 = por %p1473_p11, %p1472_p10 }
  0x73   :  { %p1475_p13 = pnand %p1474_p12, %p1468_p9 }
  0x75   :  { %1478 = shalt.err (!%p1475_p13)
}
  0x76   :  { %94 = dma.hbm_to_vmem [thread:$0]  %s1693_s6, 16, %s92_s25, [#allocation13]  }
  0x77   :  { %1501 = dma.done.wait [#allocation4], 256  }
  0x78   :  { %1502 = vsyncadd [#allocation4], 4294967040 }
  0x79   :  { %1503 = dma.done.wait [#allocation7], 4128  }
  0x7a   :  { %1504 = vsyncadd [#allocation7], 4294963168 }
  0x7b   :  { %1505 = dma.done.wait [#allocation10], 4128  }
  0x7c   :  { %1506 = vsyncadd [#allocation10], 4294963168 }
  0x7d   :  { %1507 = dma.done.wait [#allocation13], 4112  }
  0x7e   :  { %1508 = vsyncadd [#allocation13], 4294963184  ;;  %v120_v0 = vld [vmem:[#allocation6] sm:$0xff]  ;;  %v121_v1 = vld [vmem:[#allocation6 + $0x10] sm:$0xff]  ;;  %s1522_s6 = smov [#allocation15]  }
  0x7f   :  { %v122_v2 = vld [vmem:[#allocation6 + $0x20] sm:$0xff]  ;;  %v1103_v3 = vpack.c.bf16 %v121_v1, %v120_v0  ;;  %v123_v4 = vld [vmem:[#allocation6 + $0x30] sm:$0xff]  ;;  %v1663_v30 = vld [vmem:[#allocation3 + $0x8] sm:$0xff]  ;;  %s761_s3 = sshll.u32 %s1522_s6, 4  ;;  %s762_s3 = int_to_ptr.vmem [resolvable:$true] %s761_s3 }
  0x80   :  { %v1107_v5 = vpack.c.bf16 %v123_v4, %v122_v2  ;;  %v124_v6 = vld [vmem:[#allocation6 + $0x40] sm:$0xff]  ;;  %v125_v7 = vld [vmem:[#allocation6 + $0x50] sm:$0xff]  ;;  %v430_v50 = vld [vmem:[#allocation6 + $0x8] sm:$0xff]  ;;  %s1479_s0 = scalar_lea.vmem %s762_s3, 256  ;;  %p1484_p1 = scmp.lt.s32.totalorder %s762_s3, %s762_s3 }
  0x81   :  { %1104 = vmatprep.subr.bf16.mxu1 %v1103_v3  ;;  %v1111_v8 = vpack.c.bf16 %v125_v7, %v124_v6  ;;  %v1660_v9 = vld [vmem:[#allocation3] sm:$0xff]  ;;  %v126_v10 = vld [vmem:[#allocation6 + $0x60] sm:$0xff]  ;;  %v431_v51 = vld [vmem:[#allocation6 + $0x18] sm:$0xff]  ;;  %p1480_p0 = scmp.ne.s32.totalorder %s762_s3, %s1479_s0  ;;  %p1485_p2 = scmp.lt.s32.totalorder %s1479_s0, %s1479_s0 }
  0x82   :  { %1106 = vmatpush3.bf16.msra.mxu1 %v1103_v3  ;;  %v127_v11 = vld [vmem:[#allocation6 + $0x70] sm:$0xff]  ;;  %925 = vmatprep.mubr.f32.mxu1 %v1660_v9  ;;  %v128_v13 = vld [vmem:[#allocation6 + $0x80] sm:$0xff]  ;;  %v1199_v52 = vpack.c.bf16 %v431_v51, %v430_v50  ;;  %v432_v53 = vld [vmem:[#allocation6 + $0x28] sm:$0xff] }
  0x83   :  { %1108 = vmatprep.subr.bf16.mxu1 %v1107_v5  ;;  %v1115_v12 = vpack.c.bf16 %v127_v11, %v126_v10  ;;  %v129_v14 = vld [vmem:[#allocation6 + $0x90] sm:$0xff]  ;;  %v130_v16 = vld [vmem:[#allocation6 + $0xa0] sm:$0xff]  ;;  %v433_v54 = vld [vmem:[#allocation6 + $0x38] sm:$0xff]  ;;  %p1486_p3 = por %p1485_p2, %p1484_p1 }
  0x84   :  { %v1119_v15 = vpack.c.bf16 %v129_v14, %v128_v13  ;;  %v131_v17 = vld [vmem:[#allocation6 + $0xb0] sm:$0xff]  ;;  %v132_v19 = vld [vmem:[#allocation6 + $0xc0] sm:$0xff]  ;;  %v1203_v55 = vpack.c.bf16 %v433_v54, %v432_v53  ;;  %v434_v56 = vld [vmem:[#allocation6 + $0x48] sm:$0xff] }
  0x85   :  { %v1123_v18 = vpack.c.bf16 %v131_v17, %v130_v16  ;;  %v133_v20 = vld [vmem:[#allocation6 + $0xd0] sm:$0xff]  ;;  %v134_v22 = vld [vmem:[#allocation6 + $0xe0] sm:$0xff]  ;;  %v435_v57 = vld [vmem:[#allocation6 + $0x58] sm:$0xff]  ;;  %p1487_p4 = pnand %p1486_p3, %p1480_p0 }
  0x86   :  { %1110 = vmatpush3.bf16.msra.mxu1 %v1107_v5  ;;  %v1127_v21 = vpack.c.bf16 %v133_v20, %v132_v19  ;;  %v135_v23 = vld [vmem:[#allocation6 + $0xf0] sm:$0xff]  ;;  %v218_v25 = vld [vmem:[#allocation9] sm:$0xff]  ;;  %v1207_v58 = vpack.c.bf16 %v435_v57, %v434_v56  ;;  %v437_v60 = vld [vmem:[#allocation6 + $0x78] sm:$0xff] }
  0x87   :  { %1112 = vmatprep.subr.bf16.mxu1 %v1111_v8  ;;  %v1131_v24 = vpack.c.bf16 %v135_v23, %v134_v22  ;;  %v219_v26 = vld [vmem:[#allocation9 + $0x10] sm:$0xff]  ;;  %v220_v28 = vld [vmem:[#allocation9 + $0x20] sm:$0xff] }
  0x88   :  { %v1135_v27 = vpack.c.bf16 %v219_v26, %v218_v25  ;;  %v221_v29 = vld [vmem:[#allocation9 + $0x30] sm:$0xff]  ;;  %v222_v32 = vld [vmem:[#allocation9 + $0x40] sm:$0xff] }
  0x89   :  { %v1139_v31 = vpack.c.bf16 %v221_v29, %v220_v28  ;;  %v223_v33 = vld [vmem:[#allocation9 + $0x50] sm:$0xff]  ;;  %v224_v35 = vld [vmem:[#allocation9 + $0x60] sm:$0xff] }
  0x8a   :  { %1114 = vmatpush3.bf16.msra.mxu1 %v1111_v8  ;;  %v1143_v34 = vpack.c.bf16 %v223_v33, %v222_v32  ;;  %v225_v36 = vld [vmem:[#allocation9 + $0x70] sm:$0xff]  ;;  %v226_v38 = vld [vmem:[#allocation9 + $0x80] sm:$0xff] }
  0x8b   :  { %1116 = vmatprep.subr.bf16.mxu1 %v1115_v12  ;;  %v1147_v37 = vpack.c.bf16 %v225_v36, %v224_v35  ;;  %v227_v39 = vld [vmem:[#allocation9 + $0x90] sm:$0xff]  ;;  %v228_v41 = vld [vmem:[#allocation9 + $0xa0] sm:$0xff]  ;;  %v530_v36 = vld [vmem:[#allocation9 + $0x8] sm:$0xff] }
  0x8c   :  { %v1151_v40 = vpack.c.bf16 %v227_v39, %v226_v38  ;;  %v229_v42 = vld [vmem:[#allocation9 + $0xb0] sm:$0xff]  ;;  %v230_v44 = vld [vmem:[#allocation9 + $0xc0] sm:$0xff]  ;;  %v776_v39 = vld [vmem:[#allocation8] ss:$0 sm:$0xff] }
  0x8d   :  { %v1155_v43 = vpack.c.bf16 %v229_v42, %v228_v41  ;;  %v231_v45 = vld [vmem:[#allocation9 + $0xd0] sm:$0xff]  ;;  %v232_v47 = vld [vmem:[#allocation9 + $0xe0] sm:$0xff] }
  0x8e   :  { %1118 = vmatpush3.bf16.msra.mxu1 %v1115_v12  ;;  %v1159_v46 = vpack.c.bf16 %v231_v45, %v230_v44  ;;  %v233_v48 = vld [vmem:[#allocation9 + $0xf0] sm:$0xff]  ;;  %v436_v59 = vld [vmem:[#allocation6 + $0x68] sm:$0xff]  ;;  %v337_v12 = vld [vmem:[#allocation12 + $0x18] sm:$0xff] }
  0x8f   :  { %1120 = vmatprep.subr.bf16.mxu1 %v1119_v15  ;;  %v1163_v49 = vpack.c.bf16 %v233_v48, %v232_v47  ;;  %v1211_v61 = vpack.c.bf16 %v437_v60, %v436_v59  ;;  %v438_v62 = vld [vmem:[#allocation6 + $0x88] sm:$0xff]  ;;  %v439_v63 = vld [vmem:[#allocation6 + $0x98] sm:$0xff]  ;;  %v777_v51 = vld [vmem:[#allocation11] ss:$0 sm:$0xff] }
  0x90   :  { %v1215_v0 = vpack.c.bf16 %v439_v63, %v438_v62  ;;  %v440_v1 = vld [vmem:[#allocation6 + $0xa8] sm:$0xff]  ;;  %v441_v2 = vld [vmem:[#allocation6 + $0xb8] sm:$0xff] }
  0x91   :  { %v1219_v3 = vpack.c.bf16 %v441_v2, %v440_v1  ;;  %v334_v4 = vld [vmem:[#allocation12] sm:$0xff]  ;;  %v335_v5 = vld [vmem:[#allocation12 + $0x8] sm:$0xff]  ;;  %v443_v8 = vld [vmem:[#allocation6 + $0xd8] sm:$0xff] }
  0x92   :  { %1122 = vmatpush3.bf16.msra.mxu1 %v1119_v15  ;;  %v1167_v6 = vpack.c.bf16 %v335_v5, %v334_v4  ;;  %v442_v7 = vld [vmem:[#allocation6 + $0xc8] sm:$0xff]  ;;  %v336_v11 = vld [vmem:[#allocation12 + $0x10] sm:$0xff] }
  0x93   :  { %1124 = vmatprep.subr.bf16.mxu1 %v1123_v18  ;;  %v1223_v10 = vpack.c.bf16 %v443_v8, %v442_v7  ;;  %v1171_v13 = vpack.c.bf16 %v337_v12, %v336_v11  ;;  %v444_v14 = vld [vmem:[#allocation6 + $0xe8] sm:$0xff]  ;;  %v445_v15 = vld [vmem:[#allocation6 + $0xf8] sm:$0xff] }
  0x94   :  { %1168 = vmatprep.subr.bf16.mxu0 %v1167_v6  ;;  %v1227_v16 = vpack.c.bf16 %v445_v15, %v444_v14  ;;  %v338_v17 = vld [vmem:[#allocation12 + $0x20] sm:$0xff]  ;;  %v340_v20 = vld [vmem:[#allocation12 + $0x30] sm:$0xff] }
  0x95   :  { %1170 = vmatpush3.bf16.msra.mxu0 %v1167_v6  ;;  %v342_v23 = vld [vmem:[#allocation12 + $0x40] sm:$0xff]  ;;  %v344_v26 = vld [vmem:[#allocation12 + $0x50] sm:$0xff] }
  0x96   :  { %1126 = vmatpush3.bf16.msra.mxu1 %v1123_v18  ;;  %1172 = vmatprep.subr.bf16.mxu0 %v1171_v13  ;;  %v339_v18 = vld [vmem:[#allocation12 + $0x28] sm:$0xff]  ;;  %v346_v29 = vld [vmem:[#allocation12 + $0x60] sm:$0xff]  ;;  %v348_v33 = vld [vmem:[#allocation12 + $0x70] sm:$0xff] }
  0x97   :  { %1128 = vmatprep.subr.bf16.mxu1 %v1127_v21  ;;  %v1175_v19 = vpack.c.bf16 %v339_v18, %v338_v17  ;;  %v532_v59 = vld [vmem:[#allocation9 + $0x28] sm:$0xff]  ;;  %v533_v60 = vld [vmem:[#allocation9 + $0x38] sm:$0xff] }
  0x98   :  { %v1235_v63 = vpack.c.bf16 %v533_v60, %v532_v59  ;;  %v535_v1 = vld [vmem:[#allocation9 + $0x58] sm:$0xff]  ;;  %v538_v6 = vld [vmem:[#allocation9 + $0x88] sm:$0xff] }
  0x99   :  { %1174 = vmatpush3.bf16.msra.mxu0 %v1171_v13  ;;  %v537_v4 = vld [vmem:[#allocation9 + $0x78] sm:$0xff]  ;;  %v542_v13 = vld [vmem:[#allocation9 + $0xc8] sm:$0xff] }
  0x9a   :  { %1130 = vmatpush3.bf16.msra.mxu1 %v1127_v21  ;;  %1176 = vmatprep.subr.bf16.mxu0 %v1175_v19  ;;  %v341_v21 = vld [vmem:[#allocation12 + $0x38] sm:$0xff]  ;;  %v544_v15 = vld [vmem:[#allocation9 + $0xe8] sm:$0xff] }
  0x9b   :  { %1132 = vmatprep.subr.bf16.mxu1 %v1131_v24  ;;  %v1179_v22 = vpack.c.bf16 %v341_v21, %v340_v20  ;;  %v539_v7 = vld [vmem:[#allocation9 + $0x98] sm:$0xff]  ;;  %v648_v18 = vld [vmem:[#allocation12 + $0x80] sm:$0xff] }
  0x9c   :  { %v1247_v8 = vpack.c.bf16 %v539_v7, %v538_v6  ;;  %v541_v11 = vld [vmem:[#allocation9 + $0xb8] sm:$0xff] }
  0x9d   :  { %1178 = vmatpush3.bf16.msra.mxu0 %v1175_v19  ;;  %v543_v14 = vld [vmem:[#allocation9 + $0xd8] sm:$0xff]  ;;  %v649_v19 = vld [vmem:[#allocation12 + $0x88] sm:$0xff] }
  0x9e   :  { %1134 = vmatpush3.bf16.msra.mxu1 %v1131_v24  ;;  %1180 = vmatprep.subr.bf16.mxu0 %v1179_v22  ;;  %v343_v24 = vld [vmem:[#allocation12 + $0x48] sm:$0xff]  ;;  %v1263_v20 = vpack.c.bf16 %v649_v19, %v648_v18  ;;  %v650_v21 = vld [vmem:[#allocation12 + $0x90] sm:$0xff] }
  0x9f   :  { %1136 = vmatprep.subr.bf16.mxu1 %v1135_v27  ;;  %v1183_v25 = vpack.c.bf16 %v343_v24, %v342_v23  ;;  %v652_v24 = vld [vmem:[#allocation12 + $0xa0] sm:$0xff] }
  0xa1   :  { %926 = vmatmul.mubr.f32.vlgmr.msra.gmra.mrb[0].mxu1 %v1663_v30  ;;  %1182 = vmatpush3.bf16.msra.mxu0 %v1179_v22  ;;  %v651_v22 = vld [vmem:[#allocation12 + $0x98] sm:$0xff] }
  0xa2   :  { %1138 = vmatpush3.bf16.msra.mxu1 %v1135_v27  ;;  %960 = vmatprep.mubr.f32.mxu1 %v1660_v9  ;;  %v345_v27 = vld [vmem:[#allocation12 + $0x58] sm:$0xff]  ;;  %v1267_v23 = vpack.c.bf16 %v651_v22, %v650_v21 }
  0xa3   :  { %1140 = vmatprep.subr.bf16.mxu1 %v1139_v31  ;;  %1184 = vmatprep.subr.bf16.mxu0 %v1183_v25  ;;  %v1187_v28 = vpack.c.bf16 %v345_v27, %v344_v26  ;;  %v654_v27 = vld [vmem:[#allocation12 + $0xb0] sm:$0xff] }
  0xa5   :  { %1186 = vmatpush3.bf16.msra.mxu0 %v1183_v25  ;;  %v653_v25 = vld [vmem:[#allocation12 + $0xa8] sm:$0xff] }
  0xa6   :  { %1142 = vmatpush3.bf16.msra.mxu1 %v1139_v31  ;;  %1188 = vmatprep.subr.bf16.mxu0 %v1187_v28  ;;  %v347_v31 = vld [vmem:[#allocation12 + $0x68] sm:$0xff]  ;;  %v1271_v26 = vpack.c.bf16 %v653_v25, %v652_v24 }
  0xa7   :  { %1144 = vmatprep.subr.bf16.mxu1 %v1143_v34  ;;  %v1191_v32 = vpack.c.bf16 %v347_v31, %v346_v29  ;;  %v656_v31 = vld [vmem:[#allocation12 + $0xc0] sm:$0xff] }
  0xa9   :  { %1190 = vmatpush3.bf16.msra.mxu0 %v1187_v28  ;;  %v655_v28 = vld [vmem:[#allocation12 + $0xb8] sm:$0xff] }
  0xaa   :  { %1146 = vmatpush3.bf16.msra.mxu1 %v1143_v34  ;;  %1192 = vmatprep.subr.bf16.mxu0 %v1191_v32  ;;  %v349_v34 = vld [vmem:[#allocation12 + $0x78] sm:$0xff]  ;;  %v1275_v29 = vpack.c.bf16 %v655_v28, %v654_v27 }
  0xab   :  { %1148 = vmatprep.subr.bf16.mxu1 %v1147_v37  ;;  %v1195_v35 = vpack.c.bf16 %v349_v34, %v348_v33  ;;  %v658_v34 = vld [vmem:[#allocation12 + $0xd0] sm:$0xff] }
  0xad   :  { %1194 = vmatpush3.bf16.msra.mxu0 %v1191_v32  ;;  %v657_v32 = vld [vmem:[#allocation12 + $0xc8] sm:$0xff] }
  0xae   :  { %1150 = vmatpush3.bf16.msra.mxu1 %v1147_v37  ;;  %1196 = vmatprep.subr.bf16.mxu0 %v1195_v35  ;;  %v531_v37 = vld [vmem:[#allocation9 + $0x18] sm:$0xff]  ;;  %v1279_v33 = vpack.c.bf16 %v657_v32, %v656_v31 }
  0xaf   :  { %1152 = vmatprep.subr.bf16.mxu1 %v1151_v40  ;;  %v1231_v38 = vpack.c.bf16 %v531_v37, %v530_v36  ;;  %v660_v37 = vld [vmem:[#allocation12 + $0xe0] sm:$0xff] }
  0xb1   :  { %1198 = vmatpush3.bf16.msra.mxu0 %v1195_v35  ;;  %v659_v35 = vld [vmem:[#allocation12 + $0xd8] sm:$0xff] }
  0xb2   :  { %1154 = vmatpush3.bf16.msra.mxu1 %v1151_v40  ;;  %1232 = vmatprep.subr.bf16.mxu0 %v1231_v38  ;;  %v1283_v36 = vpack.c.bf16 %v659_v35, %v658_v34 }
  0xb3   :  { %1156 = vmatprep.subr.bf16.mxu1 %v1155_v43 }
  0xb6   :  { %1158 = vmatpush3.bf16.msra.mxu1 %v1155_v43 }
  0xb7   :  { %1160 = vmatprep.subr.bf16.mxu1 %v1159_v46 }
  0xba   :  { %1162 = vmatpush3.bf16.msra.mxu1 %v1159_v46 }
  0xbb   :  { %1164 = vmatprep.subr.bf16.mxu1 %v1163_v49 }
  0xbe   :  { %1166 = vmatpush3.bf16.msra.mxu1 %v1163_v49 }
  0xbf   :  { %1200 = vmatprep.subr.bf16.mxu1 %v1199_v52 }
  0xc1   :  { %961 = vmatmul.mubr.f32.vlgmr.msra.gmra.mrb[2].mxu1 %v1663_v30 }
  0xc2   :  { %1202 = vmatpush3.bf16.msra.mxu1 %v1199_v52  ;;  %1030 = vmatprep.mubr.f32.mxu1 %v1660_v9 }
  0xc3   :  { %1204 = vmatprep.subr.bf16.mxu1 %v1203_v55 }
  0xc6   :  { %1206 = vmatpush3.bf16.msra.mxu1 %v1203_v55 }
  0xc7   :  { %1208 = vmatprep.subr.bf16.mxu1 %v1207_v58 }
  0xca   :  { %1210 = vmatpush3.bf16.msra.mxu1 %v1207_v58 }
  0xcb   :  { %1212 = vmatprep.subr.bf16.mxu1 %v1211_v61 }
  0xce   :  { %1214 = vmatpush3.bf16.msra.mxu1 %v1211_v61 }
  0xcf   :  { %1216 = vmatprep.subr.bf16.mxu1 %v1215_v0 }
  0xd2   :  { %1218 = vmatpush3.bf16.msra.mxu1 %v1215_v0  ;;  %v534_v0 = vld [vmem:[#allocation9 + $0x48] sm:$0xff] }
  0xd3   :  { %1220 = vmatprep.subr.bf16.mxu1 %v1219_v3  ;;  %v1239_v2 = vpack.c.bf16 %v535_v1, %v534_v0  ;;  %v784_v0 = vld [vmem:[#allocation14] ss:$0 sm:$0xff] }
  0xd6   :  { %1222 = vmatpush3.bf16.msra.mxu1 %v1219_v3  ;;  %v536_v3 = vld [vmem:[#allocation9 + $0x68] sm:$0xff] }
  0xd7   :  { %1224 = vmatprep.subr.bf16.mxu1 %v1223_v10  ;;  %v1243_v5 = vpack.c.bf16 %v537_v4, %v536_v3 }
  0xda   :  { %1226 = vmatpush3.bf16.msra.mxu1 %v1223_v10  ;;  %v540_v10 = vld [vmem:[#allocation9 + $0xa8] sm:$0xff] }
  0xdb   :  { %1228 = vmatprep.subr.bf16.mxu1 %v1227_v16  ;;  %v1251_v12 = vpack.c.bf16 %v541_v11, %v540_v10 }
  0xde   :  { %1230 = vmatpush3.bf16.msra.mxu1 %v1227_v16  ;;  %v545_v16 = vld [vmem:[#allocation9 + $0xf8] sm:$0xff] }
  0xdf   :  { %v1259_v17 = vpack.c.bf16 %v545_v16, %v544_v15 }
  0xe1   :  { %1031 = vmatmul.mubr.f32.vlgmr.msra.gmra.mrb[4].mxu1 %v1663_v30 }
 0x174   :  { %v927_v40 = vpop.f32.mrb[0].mxu1 }
 0x175   :  { %v215_v41 = vadd.f32 %v927_v40, %v776_v39  ;;  %v209_v42 = vpop.f32.mrb[1].mxu1 }
 0x176   :  { %v210_v43 = vadd.f32 %v776_v39, %v209_v42  ;;  %v663_v42 = vld [vmem:[#allocation12 + $0xf8] sm:$0xff] }
 0x177   :  { %v779_v44 = vmul.f32 -1.442695, %v215_v41 }
 0x178   :  { %v778_v45 = vmul.f32 -1.442695, %v210_v43 }
 0x179   :  { %1309 = vpow2.f32 %v779_v44  ;;  %v780_v44 = vld [vmem:[#allocation8 + $0x1] ss:$0 sm:$0xff] }
 0x17a   :  { %1311 = vpow2.f32 %v778_v45 }
 0x183   :  { %v1310_v46 = vpop.eup %1309 }
 0x184   :  { %v1312_v47 = vpop.eup %1311  ;;  %v323_v48 = vadd.f32 1.0, %v1310_v46 }
 0x185   :  { %v322_v49 = vadd.f32 1.0, %v1312_v47 }
 0x186   :  { %1313 = vrcp.f32 %v323_v48 }
 0x187   :  { %1315 = vrcp.f32 %v322_v49 }
 0x190   :  { %v1314_v50 = vpop.eup %1313 }
 0x191   :  { %v1316_v52 = vpop.eup %1315  ;;  %v329_v54 = vmul.f32 %v1314_v50, %v215_v41  ;;  %v662_v41 = vld [vmem:[#allocation12 + $0xf0] sm:$0xff] }
 0x192   :  { %v328_v58 = vmul.f32 %v1316_v52, %v210_v43  ;;  %v1291_v43 = vpack.c.bf16 %v663_v42, %v662_v41 }
 0x194   :  { %v962_v53 = vpop.f32.mrb[2].mxu1 }
 0x195   :  { %v313_v55 = vadd.f32 %v962_v53, %v777_v51  ;;  %v307_v56 = vpop.f32.mrb[3].mxu1 }
 0x196   :  { %v308_v57 = vadd.f32 %v777_v51, %v307_v56 }
 0x197   :  { %v331_v61 = vmul.f32 %v329_v54, %v313_v55  ;;  %v781_v54 = vld [vmem:[#allocation11 + $0x1] ss:$0 sm:$0xff] }
 0x198   :  { %v330_v62 = vmul.f32 %v328_v58, %v308_v57 }
 0x19a   :  { %995 = vmatprep.mubr.f32.mxu0 %v330_v62 }
 0x19b   :  { %996 = vmatmul.mubr.f32.vlgmr.msra.gmra.mrb[0].mxu0 %v331_v61 }
 0x19c   :  { %1234 = vmatpush3.bf16.msra.mxu0 %v1231_v38  ;;  %1065 = vmatprep.mubr.f32.mxu0 %v1660_v9  ;;  %v1255_v9 = vpack.c.bf16 %v543_v14, %v542_v13 }
 0x19d   :  { %1236 = vmatprep.subr.bf16.mxu0 %v1235_v63 }
 0x1a0   :  { %1238 = vmatpush3.bf16.msra.mxu0 %v1235_v63 }
 0x1a1   :  { %1240 = vmatprep.subr.bf16.mxu0 %v1239_v2 }
 0x1a4   :  { %1242 = vmatpush3.bf16.msra.mxu0 %v1239_v2 }
 0x1a5   :  { %1244 = vmatprep.subr.bf16.mxu0 %v1243_v5 }
 0x1a8   :  { %1246 = vmatpush3.bf16.msra.mxu0 %v1243_v5 }
 0x1a9   :  { %1248 = vmatprep.subr.bf16.mxu0 %v1247_v8 }
 0x1ac   :  { %1250 = vmatpush3.bf16.msra.mxu0 %v1247_v8 }
 0x1ad   :  { %1252 = vmatprep.subr.bf16.mxu0 %v1251_v12 }
 0x1b0   :  { %1254 = vmatpush3.bf16.msra.mxu0 %v1251_v12 }
 0x1b1   :  { %1256 = vmatprep.subr.bf16.mxu0 %v1255_v9 }
 0x1b4   :  { %1258 = vmatpush3.bf16.msra.mxu0 %v1255_v9  ;;  %v1032_v39 = vpop.f32.mrb[4].mxu1 }
 0x1b5   :  { %1260 = vmatprep.subr.bf16.mxu0 %v1259_v17  ;;  %v520_v40 = vpop.f32.mrb[5].mxu1  ;;  %v526_v45 = vadd.f32 %v1032_v39, %v780_v44 }
 0x1b6   :  { %v521_v46 = vadd.f32 %v780_v44, %v520_v40 }
 0x1b7   :  { %v783_v47 = vmul.f32 -1.442695, %v526_v45 }
 0x1b8   :  { %1262 = vmatpush3.bf16.msra.mxu0 %v1259_v17  ;;  %v782_v48 = vmul.f32 -1.442695, %v521_v46 }
 0x1b9   :  { %1264 = vmatprep.subr.bf16.mxu0 %v1263_v20  ;;  %1317 = vpow2.f32 %v783_v47 }
 0x1ba   :  { %1319 = vpow2.f32 %v782_v48 }
 0x1bb   :  { %1066 = vmatmul.mubr.f32.vlgmr.msra.gmra.mrb[2].mxu0 %v1663_v30  ;;  %v661_v30 = vld [vmem:[#allocation12 + $0xe8] sm:$0xff] }
 0x1bc   :  { %1266 = vmatpush3.bf16.msra.mxu0 %v1263_v20  ;;  %v1287_v38 = vpack.c.bf16 %v661_v30, %v660_v37 }
 0x1bd   :  { %1268 = vmatprep.subr.bf16.mxu0 %v1267_v23 }
 0x1c0   :  { %1270 = vmatpush3.bf16.msra.mxu0 %v1267_v23 }
 0x1c1   :  { %1272 = vmatprep.subr.bf16.mxu0 %v1271_v26 }
 0x1c3   :  { %v1318_v49 = vpop.eup %1317 }
 0x1c4   :  { %1274 = vmatpush3.bf16.msra.mxu0 %v1271_v26  ;;  %v1320_v50 = vpop.eup %1319  ;;  %v636_v51 = vadd.f32 1.0, %v1318_v49 }
 0x1c5   :  { %1276 = vmatprep.subr.bf16.mxu0 %v1275_v29  ;;  %v635_v52 = vadd.f32 1.0, %v1320_v50 }
 0x1c6   :  { %1321 = vrcp.f32 %v636_v51 }
 0x1c7   :  { %1323 = vrcp.f32 %v635_v52 }
 0x1c8   :  { %1278 = vmatpush3.bf16.msra.mxu0 %v1275_v29 }
 0x1c9   :  { %1280 = vmatprep.subr.bf16.mxu0 %v1279_v33 }
 0x1cc   :  { %1282 = vmatpush3.bf16.msra.mxu0 %v1279_v33 }
 0x1cd   :  { %1284 = vmatprep.subr.bf16.mxu0 %v1283_v36 }
 0x1d0   :  { %1286 = vmatpush3.bf16.msra.mxu0 %v1283_v36  ;;  %v1322_v53 = vpop.eup %1321 }
 0x1d1   :  { %1288 = vmatprep.subr.bf16.mxu0 %v1287_v38  ;;  %v1324_v55 = vpop.eup %1323  ;;  %v642_v57 = vmul.f32 %v1322_v53, %v526_v45 }
 0x1d2   :  { %v641_v60 = vmul.f32 %v1324_v55, %v521_v46 }
 0x1d4   :  { %1290 = vmatpush3.bf16.msra.mxu0 %v1287_v38 }
 0x1d5   :  { %1292 = vmatprep.subr.bf16.mxu0 %v1291_v43 }
 0x1d8   :  { %1294 = vmatpush3.bf16.msra.mxu0 %v1291_v43 }
 0x28e   :  { %v1067_v56 = vpop.f32.mrb[2].mxu0 }
 0x28f   :  { %v626_v58 = vadd.f32 %v1067_v56, %v781_v54  ;;  %v620_v59 = vpop.f32.mrb[3].mxu0 }
 0x290   :  { %v621_v61 = vadd.f32 %v781_v54, %v620_v59 }
 0x291   :  { %v644_v62 = vmul.f32 %v642_v57, %v626_v58 }
 0x292   :  { %v643_v63 = vmul.f32 %v641_v60, %v621_v61 }
 0x294   :  { %1100 = vmatprep.mubr.f32.mxu0 %v643_v63 }
 0x295   :  { %1101 = vmatmul.mubr.f32.vlgmr.msra.gmra.mrb[0].mxu0 %v644_v62 }
 0x368   :  { %v1102_v1 = vpop.f32.mrb[0].mxu0 }
 0x369   :  { %v753_v2 = vadd.f32 %v1102_v1, %v784_v0  ;;  %v730_v3 = vpop.f32.mrb[1].mxu0 }
 0x36a   :  { %v752_v4 = vadd.f32 %v784_v0, %v730_v3 }
 0x36b   :  { %755 = vst [vmem:[#allocation15 + $0x8] sm:$0xff] %v753_v2 }
 0x36c   :  { %754 = vst [vmem:[#allocation15] sm:$0xff] %v752_v4 }
 0x36d   :  { %1490 = shalt.err (!%p1487_p4)
}
 0x36e   :  { %s1491_s17 = scalar_lea.hbm %s1694_s7, 256 }
 0x36f   :  { %p1492_p5 = scmp.ne.s32.totalorder %s1694_s7, %s1491_s17  ;;  %p1495_p6 = scmp.lt.u32.totalorder %s1491_s17, %s1694_s7 }
 0x371   :  { %p1497_p7 = pnand %p1495_p6, %p1492_p5 }
 0x373   :  { %1500 = shalt.err (!%p1497_p7)
}
 0x374   :  { %767 = dma.vmem_to_hbm [thread:$0]  %s762_s3, 256, %s1694_s7, [#allocation5], %s1517_s11, %s1517_s11, %s1518_s12  }
 0x375   :  { %1509 = dma.done.wait [#allocation5], 256  }
 0x376   :  { %1510 = vsyncadd [#allocation5], 4294967040 }
 0x377   :  { %771 = vsyncpa [#allocation4], 1 }
 0x378   :  { %772 = vsyncpa [#allocation7], 1 }
 0x379   :  { %773 = vsyncpa [#allocation10], 1 }
 0x37a   :  { %774 = vsyncpa [#allocation13], 1 }
 0x37b   :  { %775 = vsyncpa [#allocation5], 1 }

</bundles_post_ra>
